<compile_context>
chip_gen: v6e
topology: v6e:2x2x1
jax: 0.10.0
libtpu: 0.0.40
codegen_flags: <defaults>
</compile_context>

<pallas_src>
import functools

import jax
import jax.numpy as jnp
from jax import lax
from jax.experimental import pallas as pl
from jax.experimental.pallas import tpu as pltpu


# ---------------------------------------------------------------------------
# Fused kernel: one (batch b, query-tile qi, head h) per grid step.
# ---------------------------------------------------------------------------
def _fused_attention_kernel(
    x_ref,      # (1, N, C)       input tokens for batch b (resident per batch)
    wq_ref,     # (nh, C, dp)     per-head Q weight, lane-padded (resident)
    wk_ref,     # (nh, C, dp)     per-head K weight, lane-padded (resident)
    wv_ref,     # (nh, C, dp)     per-head V weight, lane-padded (resident)
    wp_ref,     # (nh, dp, C)     per-head out-proj weight, row-padded (resident)
    bp_ref,     # (1, C)          out-proj bias, f32 (resident)
    out_ref,    # (1, TQ, C)      output tile (resident across h, written at last h)
    amap_ref,   # (1, 1, TQ, N)   pre-softmax logits for (b, h, q-tile)
    kv_s,       # VMEM (2*nh, N, dp) dot_dtype : K (0..nh-1) | V (nh..2nh-1)
    acc_s,      # VMEM (TQ, C) f32  : per-head out-proj accumulator
    *, nh, tq, scale,
):
    qi = pl.program_id(1)
    h = pl.program_id(2)
    dot_dtype = kv_s.dtype

    # K/V projection for head h of this batch: done while processing the first
    # query tile (spreads the N x C projection over nh steps), reused by every
    # later query tile of the batch via the persistent VMEM scratch.
    @pl.when(qi == 0)
    def _():
        xb = x_ref[0].astype(dot_dtype)                            # (N, C)
        kv_s[h] = jnp.dot(xb, wk_ref[h],
                          preferred_element_type=jnp.float32).astype(dot_dtype)
        kv_s[nh + h] = jnp.dot(xb, wv_ref[h],
                               preferred_element_type=jnp.float32).astype(dot_dtype)

    row0 = pl.multiple_of(qi * tq, tq)
    xt = x_ref[0, pl.ds(row0, tq), :].astype(dot_dtype)            # (TQ, C)

    # Q for (tile, head); scale folded into q (commutes through the contraction,
    # TQ*dp multiplies instead of TQ*N).
    q_h = (jnp.dot(xt, wq_ref[h], preferred_element_type=jnp.float32)
           * scale).astype(dot_dtype)                              # (TQ, dp)
    k_h = kv_s[h]                                                  # (N, dp)
    v_h = kv_s[nh + h]                                             # (N, dp)

    # q @ k^T via contraction of the last dims (no materialized transpose).
    # dp is zero-padded from d, so the contraction is exact.
    s = lax.dot_general(
        q_h, k_h,
        dimension_numbers=(((1,), (1,)), ((), ())),
        preferred_element_type=jnp.float32,
    )                                                              # (TQ, N) f32
    amap_ref[0, 0] = s.astype(amap_ref.dtype)                      # pre-softmax map

    # Row-wise softmax in f32; denominator reciprocal on the EUP.
    m = jnp.max(s, axis=-1, keepdims=True)
    e = jnp.exp(s - m)
    p = e * pl.reciprocal(jnp.sum(e, axis=-1, keepdims=True), approx=True)

    o_h = jnp.dot(p.astype(dot_dtype), v_h,
                  preferred_element_type=jnp.float32)              # (TQ, dp)

    # Per-head slice of the output projection, accumulated in f32
    # (padded rows of wp are zero, so this equals the merged (TQ,C)@(C,C)).
    part = jnp.dot(o_h.astype(dot_dtype), wp_ref[h],
                   preferred_element_type=jnp.float32)             # (TQ, C)

    @pl.when(h == 0)
    def _():
        acc_s[...] = jnp.zeros_like(acc_s)

    acc_s[...] += part

    @pl.when(h == nh - 1)
    def _():
        out = acc_s[...] + bp_ref[...].astype(jnp.float32)         # (TQ, C)
        out_ref[0] = out.astype(out_ref.dtype)


# ---------------------------------------------------------------------------
# VMEM sizing helpers
# ---------------------------------------------------------------------------
def _physical_vmem_bytes():
    try:
        info = pltpu.get_tpu_info()
        v = getattr(info, "vmem_capacity_bytes", None)
        if v:
            return int(v)
    except Exception:
        pass
    return 64 * 1024 * 1024      # conservative fallback (v7x per-TC)


def _vmem_estimate(N, C, nh, dp, tq, x_isz, w_isz, out_isz, amap_isz, dot_isz):
    blocks = (
        2 * N * C * x_isz                    # x block (double-buffered)
        + 2 * 3 * nh * C * dp * w_isz        # wq, wk, wv (resident, 2x allowance)
        + 2 * nh * dp * C * w_isz            # w_proj
        + 2 * C * 4                          # bias (f32)
        + 2 * tq * C * out_isz               # out block
        + 2 * tq * N * amap_isz              # attn-map block
    )
    scratch = 2 * nh * N * dp * dot_isz + tq * C * 4
    return blocks + scratch


def _tq_candidates(N, sub):
    cands = {N}
    for t in range(128, N, 128):
        if N % t == 0:
            cands.add(t)
    for t in range(sub, N, sub):
        if N % t == 0:
            cands.add(t)
    return sorted(cands, reverse=True)       # largest first


# ---------------------------------------------------------------------------
# Wrapper
# ---------------------------------------------------------------------------
def attention_forward(x, params, nh, *, num_heads=8, qk_scale=None,
                      q_tile=None, compute_dtype=None, attn_map_dtype=None):
    """Pallas equivalent of Attention.forward(x, nh).

    NOTE: as in the PyTorch module, `scale` is derived from the __init__-time
    `num_heads` (dim // num_heads) even though the head split uses the
    call-time `nh`.
    """
    B, N, C = x.shape
    assert C % nh == 0, "C must be divisible by call-time nh"
    d = C // nh
    scale = (float(qk_scale) if qk_scale is not None
             else float(C // num_heads) ** -0.5)

    # MXU operand dtype: bf16 by default for f32 models (f32 matmuls are
    # multi-pass on every TPU generation); accumulation is always f32.
    if compute_dtype is not None:
        dot_dtype = jnp.dtype(compute_dtype)
    elif x.dtype == jnp.float32:
        dot_dtype = jnp.dtype(jnp.bfloat16)
    else:
        dot_dtype = jnp.dtype(x.dtype)

    out_dtype = x.dtype
    amap_dtype = (jnp.dtype(attn_map_dtype) if attn_map_dtype is not None
                  else jnp.dtype(x.dtype))

    # Head dim padded to a full 128-lane slab (exact: zero padding).
    dp = max(128, ((d + 127) // 128) * 128)

    x_isz = jnp.dtype(x.dtype).itemsize
    w_isz = dot_dtype.itemsize
    out_isz = jnp.dtype(out_dtype).itemsize
    amap_isz = amap_dtype.itemsize
    dot_isz = dot_dtype.itemsize

    # Sublane granularity required by the narrowest output dtype (8 for 4B,
    # 16 for 2B, 32 for 1B).
    sub = max(32 // min(out_isz, amap_isz), 8)

    phys_vmem = _physical_vmem_bytes()
    budget = phys_vmem - 16 * 1024 * 1024    # headroom for compiler scratch

    if q_tile is not None:
        tq = min(int(q_tile), N)
        assert N % tq == 0, "q_tile must divide N"
        assert tq == N or tq % sub == 0, f"q_tile must be a multiple of {sub}"
    else:
        # Largest query tile whose working set fits the per-core VMEM budget
        # (chip-aware: ~48 MiB usable on v7x, ~112 MiB on v5e/v6e).
        cands = _tq_candidates(N, sub)
        tq = cands[-1]
        for t in cands:
            if _vmem_estimate(N, C, nh, dp, t, x_isz, w_isz, out_isz,
                              amap_isz, dot_isz) <= budget:
                tq = t
                break
    n_qt = N // tq

    est = _vmem_estimate(N, C, nh, dp, tq, x_isz, w_isz, out_isz,
                         amap_isz, dot_isz)
    vmem_limit = int(min(phys_vmem - 12 * 1024 * 1024,
                         max(est + 8 * 1024 * 1024, 32 * 1024 * 1024)))

    # ---- one-time weight re-layout: head-major, zero-padded to dp lanes ----
    w_qkv = jnp.asarray(params["w_qkv"])         # (C, 3C): q|k|v, head-interleaved cols
    w_proj = jnp.asarray(params["w_proj"])       # (C, C)
    b_proj = jnp.asarray(params["b_proj"]).reshape(1, C).astype(jnp.float32)

    def _split_heads_cols(w):                    # (C, C) -> (nh, C, dp)
        w = w.reshape(C, nh, d).transpose(1, 0, 2)
        return jnp.pad(w, ((0, 0), (0, 0), (0, dp - d)))

    wq_p = _split_heads_cols(w_qkv[:, 0:C]).astype(dot_dtype)
    wk_p = _split_heads_cols(w_qkv[:, C:2 * C]).astype(dot_dtype)
    wv_p = _split_heads_cols(w_qkv[:, 2 * C:3 * C]).astype(dot_dtype)
    wp_p = jnp.pad(w_proj.reshape(nh, d, C),
                   ((0, 0), (0, dp - d), (0, 0))).astype(dot_dtype)   # (nh, dp, C)

    kernel = functools.partial(_fused_attention_kernel,
                               nh=nh, tq=tq, scale=scale)

    out, attn_map = pl.pallas_call(
        kernel,
        out_shape=(
            jax.ShapeDtypeStruct((B, N, C), out_dtype),
            jax.ShapeDtypeStruct((B, nh, N, N), amap_dtype),
        ),
        grid=(B, n_qt, nh),
        in_specs=[
            pl.BlockSpec((1, N, C), lambda b, qi, h: (b, 0, 0)),       # x (per batch)
            pl.BlockSpec((nh, C, dp), lambda b, qi, h: (0, 0, 0)),     # wq (resident)
            pl.BlockSpec((nh, C, dp), lambda b, qi, h: (0, 0, 0)),     # wk (resident)
            pl.BlockSpec((nh, C, dp), lambda b, qi, h: (0, 0, 0)),     # wv (resident)
            pl.BlockSpec((nh, dp, C), lambda b, qi, h: (0, 0, 0)),     # wp (resident)
            pl.BlockSpec((1, C), lambda b, qi, h: (0, 0)),             # bias (resident)
        ],
        out_specs=(
            pl.BlockSpec((1, tq, C), lambda b, qi, h: (b, qi, 0)),
            pl.BlockSpec((1, 1, tq, N), lambda b, qi, h: (b, h, qi, 0)),
        ),
        scratch_shapes=[
            pltpu.VMEM((2 * nh, N, dp), dot_dtype),   # K|V slabs for current batch
            pltpu.VMEM((tq, C), jnp.float32),         # out-proj accumulator
        ],
        compiler_params=pltpu.CompilerParams(
            dimension_semantics=("parallel", "arbitrary", "arbitrary"),
            vmem_limit_bytes=vmem_limit,
        ),
    )(x, wq_p, wk_p, wv_p, wp_p, b_proj)

    return out, attn_map


# ---------------------------------------------------------------------------
# Pure-JAX reference (for correctness check)
# ---------------------------------------------------------------------------
def attention_reference(x, params, nh, *, num_heads=8):
    B, N, C = x.shape
    scale = float(C // num_heads) ** -0.5
    qkv = x.reshape(B * N, C) @ params["w_qkv"]
    qkv = qkv.reshape(B, N, 3, C).transpose(2, 0, 1, 3)
    q, k, v = qkv[0], qkv[1], qkv[2]
    d = C // nh
    q = q.reshape(B, N, nh, d).transpose(0, 2, 1, 3)
    k = k.reshape(B, N, nh, d).transpose(0, 2, 1, 3)
    v = v.reshape(B, N, nh, d).transpose(0, 2, 1, 3)
    attn_logits = jnp.einsum("bhqd,bhkd->bhqk", q, k) * scale
    attn = jax.nn.softmax(attn_logits, axis=-1)
    o = jnp.einsum("bhqk,bhkd->bhqd", attn, v)
    o = o.transpose(0, 2, 1, 3).reshape(B * N, C)
    out = o @ params["w_proj"] + params["b_proj"]
    return out.reshape(B, N, C), attn_logits


# ---------------------------------------------------------------------------
if __name__ == "__main__":
    B, N, C = 2, 16, 32
    num_heads = 8          # module default -> scale = (C // 8) ** -0.5
    nh = 8                 # call-time head count

    key = jax.random.PRNGKey(0)
    kx, kqkv, kp, kb = jax.random.split(key, 4)

    x = jax.random.normal(kx, (B, N, C), dtype=jnp.float32)
    params = {
        # deterministic synthetic weights; stored (in_features, out_features)
        # so y = x @ W (+ b)  ==  nn.Linear with W = W_pt.T
        "w_qkv": jax.random.normal(kqkv, (C, 3 * C), dtype=jnp.float32) * 0.05,
        "w_proj": jax.random.normal(kp, (C, C), dtype=jnp.float32) * 0.05,
        "b_proj": jax.random.normal(kb, (C,), dtype=jnp.float32) * 0.01,
    }

    ref_out, ref_map = attention_reference(x, params, nh, num_heads=num_heads)

    # f32 MXU path (numerical parity with the f32 reference): auto tile (full N
    # here) and an explicitly tiled query dimension (2 tiles of 8).
    for qt in (None, 8):
        out, attn_map = attention_forward(
            x, params, nh, num_heads=num_heads, q_tile=qt,
            compute_dtype=jnp.float32)
        out = jax.block_until_ready(out)
        attn_map = jax.block_until_ready(attn_map)

        assert out.shape == (B, N, C) and attn_map.shape == (B, nh, N, N)
        # pre-softmax map is exact matmul math -> tight tolerance
        assert jnp.allclose(attn_map, ref_map, atol=1e-4, rtol=1e-4), \
            f"attn_map mismatch (f32, q_tile={qt})"
        # output uses approx reciprocal on the EUP -> slightly looser tolerance
        assert jnp.allclose(out, ref_out, atol=2e-3, rtol=2e-3), \
            f"out mismatch (f32, q_tile={qt})"

    # Default path: bf16 MXU operands for f32 inputs (recommended on all TPU
    # generations); looser tolerance versus the f32 reference.
    out, attn_map = attention_forward(x, params, nh, num_heads=num_heads)
    out = jax.block_until_ready(out)
    attn_map = jax.block_until_ready(attn_map)
    assert jnp.allclose(attn_map, ref_map, atol=3e-2, rtol=3e-2), \
        "attn_map mismatch (bf16 compute)"
    assert jnp.allclose(out, ref_out, atol=3e-2, rtol=3e-2), \
        "out mismatch (bf16 compute)"

    print("KERNEL_OK")
</pallas_src>

<mosaic_0001>
module attributes {stable_mosaic.version = 11 : i64} {
  func.func @_fused_attention_kernel(%arg0: i32, %arg1: i32, %arg2: i32, %arg3: memref<1x16x32xf32, #tpu.memory_space<vmem>>, %arg4: memref<8x32x128xf32, #tpu.memory_space<vmem>>, %arg5: memref<8x32x128xf32, #tpu.memory_space<vmem>>, %arg6: memref<8x32x128xf32, #tpu.memory_space<vmem>>, %arg7: memref<8x128x32xf32, #tpu.memory_space<vmem>>, %arg8: memref<1x32xf32, #tpu.memory_space<vmem>>, %arg9: memref<1x16x32xf32, #tpu.memory_space<vmem>>, %arg10: memref<1x1x16x16xf32, #tpu.memory_space<vmem>>, %arg11: memref<16x16x128xf32, #tpu.memory_space<vmem>>, %arg12: memref<16x32xf32, #tpu.memory_space<vmem>>) attributes {dimension_semantics = [#tpu.dimension_semantics<parallel>, #tpu.dimension_semantics<arbitrary>, #tpu.dimension_semantics<arbitrary>], iteration_bounds = array<i64: 2, 1, 8>, scalar_prefetch = 0 : i64, scratch_operands = 2 : i64, tpu.core_type = #tpu.core_type<tc>, window_params = [{transform_indices = @transform_0, window_bounds = array<i64: 1, 16, 32>}, {pipeline_mode = #tpu.pipeline_mode<synchronous>, transform_indices = @transform_1, window_bounds = array<i64: 8, 32, 128>}, {pipeline_mode = #tpu.pipeline_mode<synchronous>, transform_indices = @transform_2, window_bounds = array<i64: 8, 32, 128>}, {pipeline_mode = #tpu.pipeline_mode<synchronous>, transform_indices = @transform_3, window_bounds = array<i64: 8, 32, 128>}, {pipeline_mode = #tpu.pipeline_mode<synchronous>, transform_indices = @transform_4, window_bounds = array<i64: 8, 128, 32>}, {pipeline_mode = #tpu.pipeline_mode<synchronous>, transform_indices = @transform_5, window_bounds = array<i64: 1, 32>}, {transform_indices = @transform_6, window_bounds = array<i64: 1, 16, 32>}, {transform_indices = @transform_7, window_bounds = array<i64: 1, 1, 16, 16>}]} {
    %c0_i32 = arith.constant 0 : i32
    %0 = arith.cmpi eq, %arg1, %c0_i32 : i32
    %1 = arith.extui %0 : i1 to i32
    %c0_i32_0 = arith.constant 0 : i32
    %2 = arith.cmpi ne, %1, %c0_i32_0 : i32
    scf.if %2 {
      %c0_27 = arith.constant 0 : index
      %c0_28 = arith.constant 0 : index
      %c0_29 = arith.constant 0 : index
      %49 = vector.load %arg3[%c0_27, %c0_28, %c0_29] : memref<1x16x32xf32, #tpu.memory_space<vmem>>, vector<1x16x32xf32>
      %50 = vector.shape_cast %49 : vector<1x16x32xf32> to vector<16x32xf32>
      %51 = arith.index_cast %arg2 : i32 to index
      %c0_30 = arith.constant 0 : index
      %c0_31 = arith.constant 0 : index
      %52 = vector.load %arg5[%51, %c0_30, %c0_31] : memref<8x32x128xf32, #tpu.memory_space<vmem>>, vector<1x32x128xf32>
      %53 = vector.shape_cast %52 : vector<1x32x128xf32> to vector<32x128xf32>
      %cst_32 = arith.constant dense<0.000000e+00> : vector<16x128xf32>
      %54 = tpu.matmul %50, %53, %cst_32 {dimension_numbers = #tpu.dot_dimension_numbers<[1], [0], [0], [1], [0, 0, 1, 1], [], []>} : vector<16x32xf32>, vector<32x128xf32>, vector<16x128xf32> -> vector<16x128xf32>
      %55 = arith.index_cast %arg2 : i32 to index
      %c0_33 = arith.constant 0 : index
      %c0_34 = arith.constant 0 : index
      %56 = vector.load %arg11[%55, %c0_33, %c0_34] : memref<16x16x128xf32, #tpu.memory_space<vmem>>, vector<1x16x128xf32>
      %57 = vector.shape_cast %56 : vector<1x16x128xf32> to vector<16x128xf32>
      %58 = vector.shape_cast %54 : vector<16x128xf32> to vector<1x16x128xf32>
      tpu.vector_store %arg11[%55, %c0_33, %c0_34], %58 {strides = array<i32>} : memref<16x16x128xf32, #tpu.memory_space<vmem>>, vector<1x16x128xf32>,
      %59 = arith.index_cast %arg2 : i32 to index
      %c0_35 = arith.constant 0 : index
      %c0_36 = arith.constant 0 : index
      %60 = vector.load %arg6[%59, %c0_35, %c0_36] : memref<8x32x128xf32, #tpu.memory_space<vmem>>, vector<1x32x128xf32>
      %61 = vector.shape_cast %60 : vector<1x32x128xf32> to vector<32x128xf32>
      %cst_37 = arith.constant dense<0.000000e+00> : vector<16x128xf32>
      %62 = tpu.matmul %50, %61, %cst_37 {dimension_numbers = #tpu.dot_dimension_numbers<[1], [0], [0], [1], [0, 0, 1, 1], [], []>} : vector<16x32xf32>, vector<32x128xf32>, vector<16x128xf32> -> vector<16x128xf32>
      %c8_i32_38 = arith.constant 8 : i32
      %63 = arith.addi %c8_i32_38, %arg2 : i32
      %64 = arith.index_cast %63 : i32 to index
      %c0_39 = arith.constant 0 : index
      %c0_40 = arith.constant 0 : index
      %65 = vector.load %arg11[%64, %c0_39, %c0_40] : memref<16x16x128xf32, #tpu.memory_space<vmem>>, vector<1x16x128xf32>
      %66 = vector.shape_cast %65 : vector<1x16x128xf32> to vector<16x128xf32>
      %67 = vector.shape_cast %62 : vector<16x128xf32> to vector<1x16x128xf32>
      tpu.vector_store %arg11[%64, %c0_39, %c0_40], %67 {strides = array<i32>} : memref<16x16x128xf32, #tpu.memory_space<vmem>>, vector<1x16x128xf32>,
    } else {
    }
    %c16_i32 = arith.constant 16 : i32
    %3 = arith.muli %arg1, %c16_i32 : i32
    %4 = tpu.assume_multiple %3, 16 : i32
    %c0 = arith.constant 0 : index
    %5 = arith.index_cast %4 : i32 to index
    %c0_1 = arith.constant 0 : index
    %6 = vector.load %arg3[%c0, %5, %c0_1] : memref<1x16x32xf32, #tpu.memory_space<vmem>>, vector<1x16x32xf32>
    %7 = vector.shape_cast %6 : vector<1x16x32xf32> to vector<16x32xf32>
    %8 = arith.index_cast %arg2 : i32 to index
    %c0_2 = arith.constant 0 : index
    %c0_3 = arith.constant 0 : index
    %9 = vector.load %arg4[%8, %c0_2, %c0_3] : memref<8x32x128xf32, #tpu.memory_space<vmem>>, vector<1x32x128xf32>
    %10 = vector.shape_cast %9 : vector<1x32x128xf32> to vector<32x128xf32>
    %cst = arith.constant dense<0.000000e+00> : vector<16x128xf32>
    %11 = tpu.matmul %7, %10, %cst {dimension_numbers = #tpu.dot_dimension_numbers<[1], [0], [0], [1], [0, 0, 1, 1], [], []>} : vector<16x32xf32>, vector<32x128xf32>, vector<16x128xf32> -> vector<16x128xf32>
    %cst_4 = arith.constant 5.000000e-01 : f32
    %12 = vector.broadcast %cst_4 : f32 to vector<16x128xf32>
    %13 = arith.mulf %11, %12 : vector<16x128xf32>
    %14 = arith.index_cast %arg2 : i32 to index
    %c0_5 = arith.constant 0 : index
    %c0_6 = arith.constant 0 : index
    %15 = vector.load %arg11[%14, %c0_5, %c0_6] : memref<16x16x128xf32, #tpu.memory_space<vmem>>, vector<1x16x128xf32>
    %16 = vector.shape_cast %15 : vector<1x16x128xf32> to vector<16x128xf32>
    %c8_i32 = arith.constant 8 : i32
    %17 = arith.addi %c8_i32, %arg2 : i32
    %18 = arith.index_cast %17 : i32 to index
    %c0_7 = arith.constant 0 : index
    %c0_8 = arith.constant 0 : index
    %19 = vector.load %arg11[%18, %c0_7, %c0_8] : memref<16x16x128xf32, #tpu.memory_space<vmem>>, vector<1x16x128xf32>
    %20 = vector.shape_cast %19 : vector<1x16x128xf32> to vector<16x128xf32>
    %cst_9 = arith.constant dense<0.000000e+00> : vector<16x16xf32>
    %21 = tpu.matmul %13, %16, %cst_9 {dimension_numbers = #tpu.dot_dimension_numbers<[1], [1], [0], [0], [0, 0, 1, 0], [], []>} : vector<16x128xf32>, vector<16x128xf32>, vector<16x16xf32> -> vector<16x16xf32>
    %c0_10 = arith.constant 0 : index
    %c0_11 = arith.constant 0 : index
    %c0_12 = arith.constant 0 : index
    %c0_13 = arith.constant 0 : index
    %22 = vector.load %arg10[%c0_10, %c0_11, %c0_12, %c0_13] : memref<1x1x16x16xf32, #tpu.memory_space<vmem>>, vector<1x1x16x16xf32>
    %23 = vector.shape_cast %22 : vector<1x1x16x16xf32> to vector<16x16xf32>
    %24 = vector.shape_cast %21 : vector<16x16xf32> to vector<1x1x16x16xf32>
    tpu.vector_store %arg10[%c0_10, %c0_11, %c0_12, %c0_13], %24 {strides = array<i32>} : memref<1x1x16x16xf32, #tpu.memory_space<vmem>>, vector<1x1x16x16xf32>,
    %cst_14 = arith.constant dense<0xFF800000> : vector<16xf32>
    %25 = vector.multi_reduction <maximumf>, %21, %cst_14 [1] : vector<16x16xf32> to vector<16xf32>
    %26 = vector.shape_cast %25 : vector<16xf32> to vector<16x1xf32>
    %27 = vector.broadcast %26 : vector<16x1xf32> to vector<16x16xf32>
    %28 = arith.subf %21, %27 : vector<16x16xf32>
    %29 = math.exp %28 : vector<16x16xf32>
    %cst_15 = arith.constant dense<0.000000e+00> : vector<16xf32>
    %30 = vector.multi_reduction <add>, %29, %cst_15 [1] : vector<16x16xf32> to vector<16xf32>
    %31 = vector.shape_cast %30 : vector<16xf32> to vector<16x1xf32>
    %32 = tpu.reciprocal %31 {approx = true} : vector<16x1xf32> -> vector<16x1xf32>
    %33 = vector.broadcast %32 : vector<16x1xf32> to vector<16x16xf32>
    %34 = arith.mulf %29, %33 : vector<16x16xf32>
    %cst_16 = arith.constant dense<0.000000e+00> : vector<16x128xf32>
    %35 = tpu.matmul %34, %20, %cst_16 {dimension_numbers = #tpu.dot_dimension_numbers<[1], [0], [0], [1], [0, 0, 1, 1], [], []>} : vector<16x16xf32>, vector<16x128xf32>, vector<16x128xf32> -> vector<16x128xf32>
    %36 = arith.index_cast %arg2 : i32 to index
    %c0_17 = arith.constant 0 : index
    %c0_18 = arith.constant 0 : index
    %37 = vector.load %arg7[%36, %c0_17, %c0_18] : memref<8x128x32xf32, #tpu.memory_space<vmem>>, vector<1x128x32xf32>
    %38 = vector.shape_cast %37 : vector<1x128x32xf32> to vector<128x32xf32>
    %cst_19 = arith.constant dense<0.000000e+00> : vector<16x32xf32>
    %39 = tpu.matmul %35, %38, %cst_19 {dimension_numbers = #tpu.dot_dimension_numbers<[1], [0], [0], [1], [0, 0, 1, 1], [], []>} : vector<16x128xf32>, vector<128x32xf32>, vector<16x32xf32> -> vector<16x32xf32>
    %c0_i32_20 = arith.constant 0 : i32
    %40 = arith.cmpi eq, %arg2, %c0_i32_20 : i32
    %41 = arith.extui %40 : i1 to i32
    %c0_i32_21 = arith.constant 0 : i32
    %42 = arith.cmpi ne, %41, %c0_i32_21 : i32
    scf.if %42 {
      %cst_27 = arith.constant 0.000000e+00 : f32
      %49 = vector.broadcast %cst_27 : f32 to vector<16x32xf32>
      %c0_28 = arith.constant 0 : index
      %c0_29 = arith.constant 0 : index
      %50 = vector.load %arg12[%c0_28, %c0_29] : memref<16x32xf32, #tpu.memory_space<vmem>>, vector<16x32xf32>
      tpu.vector_store %arg12[%c0_28, %c0_29], %49 {strides = array<i32>} : memref<16x32xf32, #tpu.memory_space<vmem>>, vector<16x32xf32>,
    } else {
    }
    %c0_22 = arith.constant 0 : index
    %c0_23 = arith.constant 0 : index
    %43 = vector.load %arg12[%c0_22, %c0_23] : memref<16x32xf32, #tpu.memory_space<vmem>>, vector<16x32xf32>
    %44 = arith.addf %43, %39 : vector<16x32xf32>
    %c0_24 = arith.constant 0 : index
    %c0_25 = arith.constant 0 : index
    %45 = vector.load %arg12[%c0_24, %c0_25] : memref<16x32xf32, #tpu.memory_space<vmem>>, vector<16x32xf32>
    tpu.vector_store %arg12[%c0_24, %c0_25], %44 {strides = array<i32>} : memref<16x32xf32, #tpu.memory_space<vmem>>, vector<16x32xf32>,
    %c7_i32 = arith.constant 7 : i32
    %46 = arith.cmpi eq, %arg2, %c7_i32 : i32
    %47 = arith.extui %46 : i1 to i32
    %c0_i32_26 = arith.constant 0 : i32
    %48 = arith.cmpi ne, %47, %c0_i32_26 : i32
    scf.if %48 {
      %c0_27 = arith.constant 0 : index
      %c0_28 = arith.constant 0 : index
      %49 = vector.load %arg12[%c0_27, %c0_28] : memref<16x32xf32, #tpu.memory_space<vmem>>, vector<16x32xf32>
      %c0_29 = arith.constant 0 : index
      %c0_30 = arith.constant 0 : index
      %50 = vector.load %arg8[%c0_29, %c0_30] : memref<1x32xf32, #tpu.memory_space<vmem>>, vector<1x32xf32>
      %51 = vector.broadcast %50 : vector<1x32xf32> to vector<16x32xf32>
      %52 = arith.addf %49, %51 : vector<16x32xf32>
      %c0_31 = arith.constant 0 : index
      %c0_32 = arith.constant 0 : index
      %c0_33 = arith.constant 0 : index
      %53 = vector.load %arg9[%c0_31, %c0_32, %c0_33] : memref<1x16x32xf32, #tpu.memory_space<vmem>>, vector<1x16x32xf32>
      %54 = vector.shape_cast %53 : vector<1x16x32xf32> to vector<16x32xf32>
      %55 = vector.shape_cast %52 : vector<16x32xf32> to vector<1x16x32xf32>
      tpu.vector_store %arg9[%c0_31, %c0_32, %c0_33], %55 {strides = array<i32>} : memref<1x16x32xf32, #tpu.memory_space<vmem>>, vector<1x16x32xf32>,
    } else {
    }
    return
  }
  func.func @transform_0(%arg0: i32, %arg1: i32, %arg2: i32) -> (i32, i32, i32) {
    %c0_i32 = arith.constant 0 : i32
    %c0_i32_0 = arith.constant 0 : i32
    %c0_i32_1 = arith.constant 0 : i32
    return %arg0, %c0_i32, %c0_i32_0 : i32, i32, i32
  }
  func.func @transform_1(%arg0: i32, %arg1: i32, %arg2: i32) -> (i32, i32, i32) {
    %c0_i32 = arith.constant 0 : i32
    %c0_i32_0 = arith.constant 0 : i32
    %c0_i32_1 = arith.constant 0 : i32
    %c0_i32_2 = arith.constant 0 : i32
    return %c0_i32, %c0_i32_0, %c0_i32_1 : i32, i32, i32
  }
  func.func @transform_2(%arg0: i32, %arg1: i32, %arg2: i32) -> (i32, i32, i32) {
    %c0_i32 = arith.constant 0 : i32
    %c0_i32_0 = arith.constant 0 : i32
    %c0_i32_1 = arith.constant 0 : i32
    %c0_i32_2 = arith.constant 0 : i32
    return %c0_i32, %c0_i32_0, %c0_i32_1 : i32, i32, i32
  }
  func.func @transform_3(%arg0: i32, %arg1: i32, %arg2: i32) -> (i32, i32, i32) {
    %c0_i32 = arith.constant 0 : i32
    %c0_i32_0 = arith.constant 0 : i32
    %c0_i32_1 = arith.constant 0 : i32
    %c0_i32_2 = arith.constant 0 : i32
    return %c0_i32, %c0_i32_0, %c0_i32_1 : i32, i32, i32
  }
  func.func @transform_4(%arg0: i32, %arg1: i32, %arg2: i32) -> (i32, i32, i32) {
    %c0_i32 = arith.constant 0 : i32
    %c0_i32_0 = arith.constant 0 : i32
    %c0_i32_1 = arith.constant 0 : i32
    %c0_i32_2 = arith.constant 0 : i32
    return %c0_i32, %c0_i32_0, %c0_i32_1 : i32, i32, i32
  }
  func.func @transform_5(%arg0: i32, %arg1: i32, %arg2: i32) -> (i32, i32) {
    %c0_i32 = arith.constant 0 : i32
    %c0_i32_0 = arith.constant 0 : i32
    %c0_i32_1 = arith.constant 0 : i32
    return %c0_i32, %c0_i32_0 : i32, i32
  }
  func.func @transform_6(%arg0: i32, %arg1: i32, %arg2: i32) -> (i32, i32, i32) {
    %c0_i32 = arith.constant 0 : i32
    %c0_i32_0 = arith.constant 0 : i32
    return %arg0, %arg1, %c0_i32 : i32, i32, i32
  }
  func.func @transform_7(%arg0: i32, %arg1: i32, %arg2: i32) -> (i32, i32, i32, i32) {
    %c0_i32 = arith.constant 0 : i32
    %c0_i32_0 = arith.constant 0 : i32
    return %arg0, %arg2, %arg1, %c0_i32 : i32, i32, i32, i32
  }
}

</mosaic_0001>

<bundles_post_ra>
// kernel: tpu_custom_call.1
= control target key start
LH: loop header
LB: loop body
LE: loop exit
PB: predicated region body
PF: predicated region fallthrough
CT: control target
= control target key end

     0   :  { %s1862_s0 = inlined_call_operand.vmem [shape: f32[2,16,32], index: 0, kind: input, shape index: {}]   ;;  %s1863_s1 = inlined_call_operand.vmem [shape: f32[8,32,128], index: 1, kind: input, shape index: {}]   ;;  %s1864_s2 = inlined_call_operand.vmem [shape: f32[8,32,128], index: 2, kind: input, shape index: {}]   ;;  %s1865_s3 = inlined_call_operand.vmem [shape: f32[8,32,128], index: 3, kind: input, shape index: {}]   ;;  %s1866_s4 = inlined_call_operand.vmem [shape: f32[8,128,32], index: 4, kind: input, shape index: {}]   ;;  %s1867_s5 = inlined_call_operand.vmem [shape: f32[1,32], index: 5, kind: input, shape index: {}]   ;;  %s1868_s6 = inlined_call_operand.hbm [shape: f32[2,16,32], index: 6, kind: output, shape index: {0}]   ;;  %s1869_s7 = inlined_call_operand.hbm [shape: f32[2,8,16,16], index: 7, kind: output, shape index: {1}]  }
   0x1   :  { %1878 = sst [smem:[#allocation17_spill]] %s1862_s0 }
   0x2   :  { %1879 = sst [smem:[#allocation18_spill]] %s1863_s1 }
   0x3   :  { %1880 = sst [smem:[#allocation19_spill]] %s1864_s2 }
   0x4   :  { %1881 = sst [smem:[#allocation20_spill]] %s1865_s3 }
   0x5   :  { %1882 = sst [smem:[#allocation21_spill]] %s1866_s4 }
   0x6   :  { %13 = vsyncpa [#allocation5], 0 }
   0x7   :  { %15 = vsyncpa [#allocation5 + $0x1], 0 }
   0x8   :  { %16 = vsyncpa [#allocation7], 0 }
   0x9   :  { %18 = vsyncpa [#allocation7 + $0x1], 0  ;;  %s1553_s24 = smov 0   ;;  %s1555_s25 = smov 0  }
   0xa   :  { %s1557_s26 = smov 0   ;;  %s1559_s27 = smov 0  }
   0xb   :  { %s1561_s28 = smov 0   ;;  %s1563_s29 = smov 0  }
   0xc   :  { %s1565_s30 = smov 0   ;;  %s1567_s8 = smov 0  }
   0xd   :  { %s1569_s9 = smov 0   ;;  %s1571_s10 = smov 0  }
   0xe   :  { %s1573_s11 = smov 0  }
   0xf LB: > { %1883 = sst [smem:[#allocation10_spill]] %s1478_s27  ;;  %s1081_s12 = sadd.s32 4294967295, %s1506_s11   ;;  %s1506_s11 = sphi %s1573_s11, %s24_s11   ;;  %s1502_s10 = sphi %s1571_s10, %s1909_s10   ;;  %s1498_s9 = sphi %s1569_s9, %s1915_s9   ;;  %s1494_s8 = sphi %s1567_s8, %s1907_s8   ;;  %s1490_s30 = sphi %s1565_s30, %s1906_s30   ;;  %s1486_s29 = sphi %s1563_s29, %s1905_s29   ;;  %s1482_s28 = sphi %s1561_s28, %s1914_s28   ;;  %s1478_s27 = sphi %s1559_s27, %s1913_s27   ;;  %s1474_s26 = sphi %s1557_s26, %s1912_s26   ;;  %s1470_s25 = sphi %s1555_s25, %s1911_s25   ;;  %s1466_s24 = sphi %s1553_s24, %s1910_s24  }
  0x10   : > { %1884 = sst [smem:[#allocation11_spill]] %s1486_s29  ;;  %s1082_s13 = sadd.s32 4294967294, %s1506_s11  }
  0x11   : > { %1885 = sst [smem:[#allocation12_spill]] %s1498_s9  ;;  %s36_s14 = sadd.s32 1, %s1498_s9 }
  0x12   : > { %1886 = sst [smem:[#allocation13_spill]] %s1502_s10  ;;  %s43_s15 = sadd.s32 1, %s1502_s10 }
  0x13   : > { %p37_p0 = scmp.ge.s32.totalorder %s36_s14, 8  ;;  %s183_s16 = sadd.s32 1, %s1486_s29 }
  0x14   : > { %p193_p1 = scmp.ne.s32.totalorder %s1486_s29, %s1482_s28  ;;  %p1615_p2 = scmp.eq.s32.totalorder %s1081_s12, 15 }
  0x15   : > { %s1917_s14 = smov (%p37_p0, %s36_s14), 0  ;;  %s1919_s15 = smov (!%p37_p0, %s43_s15), %s1502_s10 }
  0x16   : > { %1888 = sst [smem:[#allocation14_spill]] %s1917_s14  ;;  %p1624_p3 = por %p1615_p2, %p193_p1 }
  0x17   : > { %p199_p4 = scmp.ne.s32.totalorder %s1482_s28, %s1478_s27  ;;  %p45_p5 = scmp.ge.s32.totalorder %s1919_s15, 2 }
  0x18   : > { %p1630_p6 = scmp.eq.s32.totalorder %s1082_s13, 15  ;;  %s207_s20 = ssub.s32 %s1498_s9, %s1917_s14 }
  0x19   : > { %s213_s21 = sadd.s32 1, %s1474_s26  ;;  %s1921_s15 = smov (%p45_p5, %s1919_s15), 0 }
  0x1a   : > { %1891 = sst [smem:[#allocation15_spill]] %s1921_s15  ;;  %p1641_p7 = por %p1630_p6, %p199_p4 }
  0x1b   : > { %p223_p8 = scmp.ne.s32.totalorder %s1474_s26, %s1470_s25  ;;  %s178_s23 = ssub.s32 %s1502_s10, %s1921_s15 }
  0x1c   : > { %p229_p9 = scmp.ne.s32.totalorder %s1470_s25, %s1466_s24  ;;  %p181_p10 = scmp.eq.s32.totalorder %s178_s23, 0 }
  0x1d   : > { %s208_s12 = sor.u32 %s207_s20, %s178_s23  ;;  %p1653_p12 = por %p223_p8, %p1615_p2 }
  0x1e   : > { %p211_p11 = scmp.eq.s32.totalorder %s208_s12, 0  ;;  %p1665_p13 = por %p229_p9, %p1630_p6 }
  0x1f   : > { %s1658_s14 = scalar_select %p181_p10, %s1486_s29, %s183_s16  }
  0x20   : > { %s1661_s9 = scalar_select %p211_p11, %s1474_s26, %s213_s21  }
  0x21   : > { %1894 = sst [smem:[#allocation16_spill]] %s1658_s14  ;;  %p1085_p0 = scmp.ge.s32.totalorder %s1506_s11, 1 }
  0x22   : > { %p271_p1 = scmp.lt.s32.totalorder %s1506_s11, 17 }
  0x24   : > { %p272_p4 = pnand %p1085_p0, %p271_p1 }
  0x25   : > { %s1875_s17 = sand.u32 (!%p272_p4), 1, %s1482_s28   ;;  %s1673_s20 = sshll.u32 (!%p272_p4), %s1490_s30, 5 }
  0x26   : > { %275 = sbr.rel (%p272_p4) target bundleno = 1243 (0x4db), region = 44  ;;  %s1677_s16 = sshll.u32 (!%p272_p4), %s1875_s17, 4 }
  0x27   : > { %s1896_s2 = sld [smem:[#allocation19_spill]] (!%p272_p4)  ;;  %p308_p2 = scmp.lt.s32.totalorder (!%p272_p4), %s1494_s8, 1 }
  0x28   : > { %s1897_s3 = sld [smem:[#allocation20_spill]] (!%p272_p4)  ;;  %s300_s29 = scalar_lea.vmem (!%p272_p4), [#allocation4], %s1677_s16 }
  0x29   : > { %s1898_s0 = sld [smem:[#allocation17_spill]] (!%p272_p4)  ;;  %p1109_p5 = scmp.ne.s32.totalorder (!%p272_p4), %s1490_s30, 0 }
  0x2a   : > { %s1899_s1 = sld [smem:[#allocation18_spill]] (!%p272_p4) }
  0x2b   : > { %s309_s12 = scalar_select %p308_p2, %s1494_s8, 1  ;;  %vm327_vm0 = vcmask 261120   ;;  %vm676_vm1 = vcmask 130048  }
  0x2c   : > { %s1900_s4 = sld [smem:[#allocation21_spill]] }
  0x2d   : > { %s322_s23 = scalar_lea.vmem %s1896_s2, %s1673_s20  ;;  %s1121_s17 = sshll.u32 %s309_s12, 4 }
  0x2e   : > { %v326_v0 = vld [vmem:[%s322_s23 + $0x18] sm:$0xff]  ;;  %v325_v1 = vld [vmem:[%s322_s23 + $0x10] sm:$0xff]  ;;  %v324_v2 = vld [vmem:[%s322_s23 + $0x8] sm:$0xff]  ;;  %s413_s14 = scalar_lea.vmem %s1897_s3, %s1673_s20 }
  0x2f   : > { %1167 = vmatprep.subr.mxu0 %v326_v0  ;;  %v323_v3 = vld [vmem:[%s322_s23] sm:$0xff]  ;;  %s312_s21 = scalar_lea.vmem %s1898_s0, %s1121_s17  ;;  %v417_v6 = vld [vmem:[%s413_s14 + $0x18] sm:$0xff]  ;;  %v416_v7 = vld [vmem:[%s413_s14 + $0x10] sm:$0xff]  ;;  %s1108_s23 = sshll.u32 %s1490_s30, 7 }
  0x30   : > { %1168 = vmatpush3.msra.mxu0 %v326_v0  ;;  %v319_v4 = vld [vmem:[%s312_s21] sm:$0xff]  ;;  %v320_v5 = vld [vmem:[%s312_s21 + $0x8] sm:$0xff]  ;;  %s503_s15 = scalar_lea.vmem %s1899_s1, %s1673_s20 }
  0x31   : > { %1169 = vmatprep.subr.mxu0 %v325_v1  ;;  %1175 = vmatprep.mubr.msk.f32.mxu0 %vm327_vm0, %v319_v4  ;;  %v415_v8 = vld [vmem:[%s413_s14 + $0x8] sm:$0xff]  ;;  %v414_v9 = vld [vmem:[%s413_s14] sm:$0xff]  ;;  %v507_v10 = vld [vmem:[%s503_s15 + $0x18] sm:$0xff]  ;;  %s1877_s14 = sand.u32 1, %s1470_s25  }
  0x32   : > { %1170 = vmatpush3.msra.mxu0 %v325_v1  ;;  %v506_v11 = vld [vmem:[%s503_s15 + $0x10] sm:$0xff]  ;;  %v505_v12 = vld [vmem:[%s503_s15 + $0x8] sm:$0xff]  ;;  %v504_v13 = vld [vmem:[%s503_s15] sm:$0xff]  ;;  %s1087_s17 = sshll.u32 %s1877_s14, 4  ;;  %s1719_s21 = scalar_lea.vmem %s1900_s4, %s1108_s23 }
  0x33   : > { %1171 = vmatprep.subr.mxu0 %v324_v2  ;;  %s1705_s20 = scalar_lea.vmem [#allocation6], %s1087_s17  ;;  %v799_v36 = vld [vmem:[%s1719_s21 + $0x78] sm:$0xff]  ;;  %v798_v37 = vld [vmem:[%s1719_s21 + $0x70] sm:$0xff]  ;;  %v797_v38 = vld [vmem:[%s1719_s21 + $0x68] sm:$0xff] }
  0x34   : > { %1172 = vmatpush3.msra.mxu0 %v324_v2  ;;  %1214 = vmatprep.subr.mxu1 %v799_v36  ;;  %v796_v39 = vld [vmem:[%s1719_s21 + $0x60] sm:$0xff]  ;;  %v795_v40 = vld [vmem:[%s1719_s21 + $0x58] sm:$0xff]  ;;  %v794_v41 = vld [vmem:[%s1719_s21 + $0x50] sm:$0xff] }
  0x35   : > { %1173 = vmatprep.subr.mxu0 %v323_v3  ;;  %1215 = vmatpush3.msra.mxu1 %v799_v36  ;;  %v793_v42 = vld [vmem:[%s1719_s21 + $0x48] sm:$0xff]  ;;  %v792_v43 = vld [vmem:[%s1719_s21 + $0x40] sm:$0xff]  ;;  %v791_v44 = vld [vmem:[%s1719_s21 + $0x38] sm:$0xff] }
  0x36   : > { %1174 = vmatpush3.msra.mxu0 %v323_v3  ;;  %1216 = vmatprep.subr.mxu1 %v798_v37  ;;  %v790_v45 = vld [vmem:[%s1719_s21 + $0x30] sm:$0xff]  ;;  %v789_v46 = vld [vmem:[%s1719_s21 + $0x28] sm:$0xff]  ;;  %v788_v47 = vld [vmem:[%s1719_s21 + $0x20] sm:$0xff] }
  0x37   : > { %1176 = vmatmul.mubr.msk.f32.vlgmr.msra.gmra.mxu0 %vm327_vm0, %v320_v5  ;;  %1178 = vmatprep.subr.mxu0 %v417_v6  ;;  %v787_v48 = vld [vmem:[%s1719_s21 + $0x18] sm:$0xff]  ;;  %v786_v49 = vld [vmem:[%s1719_s21 + $0x10] sm:$0xff]  ;;  %v785_v56 = vld [vmem:[%s1719_s21 + $0x8] sm:$0xff] }
  0x38   : > { %1179 = vmatpush3.msra.mxu0 %v417_v6  ;;  %1186 = vmatprep.mubr.msk.f32.mxu0 %vm327_vm0, %v319_v4  ;;  %v784_v57 = vld [vmem:[%s1719_s21] sm:$0xff] }
  0x39   : > { %1180 = vmatprep.subr.mxu0 %v416_v7  ;;  %1217 = vmatpush3.msra.mxu1 %v798_v37 }
  0x3a   : > { %1181 = vmatpush3.msra.mxu0 %v416_v7  ;;  %1218 = vmatprep.subr.mxu1 %v797_v38 }
  0x3b   : > { %1182 = vmatprep.subr.mxu0 %v415_v8  ;;  %1219 = vmatpush3.msra.mxu1 %v797_v38 }
  0x3c   : > { %1183 = vmatpush3.msra.mxu0 %v415_v8  ;;  %1220 = vmatprep.subr.mxu1 %v796_v39 }
  0x3d   : > { %1184 = vmatprep.subr.mxu0 %v414_v9  ;;  %1221 = vmatpush3.msra.mxu1 %v796_v39 }
  0x3e   : > { %1185 = vmatpush3.msra.mxu0 %v414_v9  ;;  %1222 = vmatprep.subr.mxu1 %v795_v40 }
  0x3f   : > { %1187 = vmatmul.mubr.msk.f32.vlgmr.msra.gmra.mxu0 %vm327_vm0, %v320_v5  ;;  %1189 = vmatprep.subr.mxu0 %v507_v10 }
  0x40   : > { %1190 = vmatpush3.msra.mxu0 %v507_v10  ;;  %1197 = vmatprep.mubr.msk.f32.mxu0 %vm327_vm0, %v319_v4 }
  0x41   : > { %1191 = vmatprep.subr.mxu0 %v506_v11  ;;  %1223 = vmatpush3.msra.mxu1 %v795_v40 }
  0x42   : > { %1192 = vmatpush3.msra.mxu0 %v506_v11  ;;  %1224 = vmatprep.subr.mxu1 %v794_v41 }
  0x43   : > { %1193 = vmatprep.subr.mxu0 %v505_v12  ;;  %1225 = vmatpush3.msra.mxu1 %v794_v41 }
  0x44   : > { %1194 = vmatpush3.msra.mxu0 %v505_v12  ;;  %1226 = vmatprep.subr.mxu1 %v793_v42 }
  0x45   : > { %1195 = vmatprep.subr.mxu0 %v504_v13  ;;  %1227 = vmatpush3.msra.mxu1 %v793_v42 }
  0x46   : > { %1196 = vmatpush3.msra.mxu0 %v504_v13  ;;  %1228 = vmatprep.subr.mxu1 %v792_v43 }
  0x47   : > { %1198 = vmatmul.mubr.msk.f32.vlgmr.msra.gmra.mxu0 %vm327_vm0, %v320_v5  ;;  %1229 = vmatpush3.msra.mxu1 %v792_v43 }
  0x48   : > { %1230 = vmatprep.subr.mxu1 %v791_v44 }
  0x49   : > { %1231 = vmatpush3.msra.mxu1 %v791_v44 }
  0x4a   : > { %1232 = vmatprep.subr.mxu1 %v790_v45 }
  0x4b   : > { %1233 = vmatpush3.msra.mxu1 %v790_v45 }
  0x4c   : > { %1234 = vmatprep.subr.mxu1 %v789_v46 }
  0x4d   : > { %1235 = vmatpush3.msra.mxu1 %v789_v46 }
  0x4e   : > { %1236 = vmatprep.subr.mxu1 %v788_v47 }
  0x4f   : > { %1237 = vmatpush3.msra.mxu1 %v788_v47 }
  0x50   : > { %1238 = vmatprep.subr.mxu1 %v787_v48 }
  0x51   : > { %1239 = vmatpush3.msra.mxu1 %v787_v48 }
  0x52   : > { %1240 = vmatprep.subr.mxu1 %v786_v49 }
  0x53   : > { %1241 = vmatpush3.msra.mxu1 %v786_v49 }
  0x54   : > { %1242 = vmatprep.subr.mxu1 %v785_v56 }
  0x55   : > { %1243 = vmatpush3.msra.mxu1 %v785_v56 }
  0x56   : > { %1244 = vmatprep.subr.mxu1 %v784_v57 }
  0x57   : > { %1245 = vmatpush3.msra.mxu1 %v784_v57 }
  0xf7   : > { %v1177_v14 = vpop.f32.mrf.mxu0 }
  0xf8   : > { %1200 = vmatprep.subr.mxu0 %v1177_v14 }
  0xf9   : > { %v400_v15 = vpop.f32.mrf.mxu0  ;;  %1201 = vmatpush3.xpose.msra.mxu0 %v1177_v14 }
  0xfa   : > { %1202 = vmatprep.subr.mxu0 %v400_v15 }
  0xfd   : > { %1203 = vmatpush3.xpose.msra.mxu0 %v400_v15 }
  0xff   : > { %v1188_v16 = vpop.f32.mrf.mxu0 }
 0x100   : > { %1207 = vmatprep.subr.mxu0 %v1188_v16 }
 0x101   : > { %v484_v17 = vpop.f32.mrf.mxu0 }
 0x107   : > { %v1199_v18 = vpop.f32.mrf.mxu0 }
 0x108   : > { %v591_v21 = vmul.f32 0.5, %v1199_v18 }
 0x109   : > { %v581_v19 = vpop.f32.mrf.mxu0 }
 0x10a   : > { %v590_v20 = vmul.f32 0.5, %v581_v19 }
 0x10c   : > { %1204 = vmatprep.mubr.f32.mxu0 %v590_v20 }
 0x10d   : > { %1205 = vmatmul.mubr.f32.vlgmr.msra.gmra.mxu0 %v591_v21 }
 0x10e   : > { %1208 = vmatpush3.msra.mxu0 %v1188_v16 }
 0x10f   : > { %1209 = vmatprep.subr.mxu0 %v484_v17 }
 0x110   : > { %1210 = vmatpush3.msra.mxu0 %v484_v17 }
 0x1cd   : > { %v1206_v22 = vpop.f32.mrf.mxu0 }
 0x1ce   : > { %678 = vst.msk [vmem:[%s1705_s20 + $0x8] sm:$0xff] %vm676_vm1, %v1206_v22  ;;  %v682_v25 = vsel %vm676_vm1, %v1206_v22, -inf }
 0x1cf   : > { %v667_v23 = vpop.f32.mrf.mxu0 }
 0x1d0   : > { %677 = vst.msk [vmem:[%s1705_s20] sm:$0xff] %vm676_vm1, %v667_v23  ;;  %v679_v24 = vsel %vm676_vm1, %v667_v23, -inf }
 0x1d1   : > { %680 = vmax.xlane.f32.xlu0 %v679_v24 }
 0x1d5   : > { %683 = vmax.xlane.f32.xlu0 %v682_v25 }
 0x25a   : > { %v681_v26 = vpop.xlane.xlu0 %680 }
 0x25b   : > { %v685_v27 = vsub.f32 %v667_v23, %v681_v26 }
 0x25d   : > { %v687_v28 = vmul.f32 1.442695, %v685_v27 }
 0x25e   : > { %v684_v29 = vpop.xlane.xlu0 %683 }
 0x25f   : > { %1352 = vpow2.f32 %v687_v28  ;;  %v686_v30 = vsub.f32 %v1206_v22, %v684_v29 }
 0x261   : > { %v689_v31 = vmul.f32 1.442695, %v686_v30 }
 0x263   : > { %1354 = vpow2.f32 %v689_v31 }
 0x26c   : > { %v1353_v32 = vpop.eup %1352 }
 0x26d   : > { %v691_v33 = vsel %vm676_vm1, %v1353_v32, 0.0 }
 0x26e   : > { %692 = vadd.xlane.f32.xlu1 %v691_v33 }
 0x270   : > { %v1355_v34 = vpop.eup %1354 }
 0x271   : > { %v694_v35 = vsel %vm676_vm1, %v1355_v34, 0.0 }
 0x272   : > { %695 = vadd.xlane.f32.xlu1 %v694_v35 }
 0x2f7   : > { %v693_v50 = vpop.xlane.xlu1 %692 }
 0x2f8   : > { %1356 = vrcp.f32 %v693_v50 }
 0x2fb   : > { %v696_v51 = vpop.xlane.xlu1 %695 }
 0x2fc   : > { %1358 = vrcp.f32 %v696_v51 }
 0x305   : > { %v1357_v52 = vpop.eup %1356 }
 0x306   : > { %v699_v53 = vmul.f32 %v1357_v52, %v1353_v32 }
 0x308   : > { %1211 = vmatprep.mubr.msk.f32.mxu0 %vm676_vm1, %v699_v53 }
 0x309   : > { %v1359_v54 = vpop.eup %1358 }
 0x30a   : > { %v700_v55 = vmul.f32 %v1359_v54, %v1355_v34 }
 0x30c   : > { %1212 = vmatmul.mubr.msk.f32.vlgmr.msra.gmra.mxu0 %vm676_vm1, %v700_v55 }
 0x3cc   : > { %v1213_v58 = vpop.f32.mrf.mxu0 }
 0x3ce   : > { %v773_v59 = vpop.f32.mrf.mxu0 }
 0x3cf   : > { %1246 = vmatprep.mubr.f32.mxu1 %v773_v59 }
 0x3d0   : > { %1247 = vmatmul.mubr.f32.vlgmr.msra.gmra.mxu1 %v1213_v58 }
 0x48e   : > { %878 = sbr.rel (%p1109_p5) target bundleno = 1173 (0x495), region = 52 }
 0x490   : > { %v1248_v60 = vpop.f32.mrf.mxu1 }
 0x492   : > { %v866_v61 = vpop.f32.mrf.mxu1 }
 0x493   : > { %v1508_v62 = vmov 0.0  }
 0x494   : > { %879 = vst.msk [vmem:[#allocation3] sm:$0xff] %vm327_vm0, %v1508_v62  ;;  %880 = vst.msk [vmem:[#allocation3 + $0x8] sm:$0xff] %vm327_vm0, %v1508_v62 }
 0x495 PF: > { %p1110_p6 = scmp.ne.s32.totalorder %s1490_s30, 7 }
 0x49a   : > { %890 = sbr.rel (%p1110_p6) target bundleno = 1193 (0x4a9), region = 56 }
 0x49b   : > { %v881_v63 = vld [vmem:[#allocation3] sm:$0xff]  ;;  %v882_v0 = vld [vmem:[#allocation3 + $0x8] sm:$0xff] }
 0x49c   : > { %v883_v1 = vadd.f32 %v881_v63, %v866_v61  ;;  %v884_v2 = vadd.f32 %v1248_v60, %v882_v0 }
 0x49e   : > { %885 = vst.msk [vmem:[#allocation3] sm:$0xff] %vm327_vm0, %v883_v1  ;;  %886 = vst.msk [vmem:[#allocation3 + $0x8] sm:$0xff] %vm327_vm0, %v884_v2 }
 0x49f   : > { %v1111_v4 = vld [vmem:[%s1867_s5] ss:$0 sm:$0xff] }
 0x4a5   : > { %v891_v3 = vld [vmem:[#allocation3] sm:$0xff]  ;;  %v892_v5 = vld [vmem:[#allocation3 + $0x8] sm:$0xff] }
 0x4a6   : > { %v900_v6 = vadd.f32 %v1111_v4, %v891_v3  ;;  %v901_v7 = vadd.f32 %v1111_v4, %v892_v5 }
 0x4a8   : > { %902 = vst.msk [vmem:[%s300_s29] sm:$0xff] %vm327_vm0, %v900_v6  ;;  %903 = vst.msk [vmem:[%s300_s29 + $0x8] sm:$0xff] %vm327_vm0, %v901_v7 }
 0x4a9 PF: > { %s1122_s15 = sshll.u32 %s1494_s8, 8  ;;  %s925_s19 = sshll.u32 %s300_s29, 4  ;;  %s1757_s19 = int_to_ptr.vmem [resolvable:$true] %s925_s19 }
 0x4aa   : > { %s1755_s12 = scalar_lea.hbm %s1868_s6, %s1122_s15  ;;  %s1901_s21 = sand.u32 1, %s1482_s28  }
 0x4ab   : > { %s1761_s16 = scalar_lea.sflag [#allocation5], %s1901_s21  ;;  %s1360_s10 = scalar_lea.vmem %s1757_s19, 256 }
 0x4ac   : > { %p1361_p8 = scmp.ne.s32.totalorder %s1757_s19, %s1360_s10  ;;  %s1509_s14 = smov [#allocation4]  }
 0x4ad   : > { %s1364_s0 = sshll.u32 %s1509_s14, 4  ;;  %s1365_s0 = int_to_ptr.vmem [resolvable:$false] %s1364_s0 }
 0x4ae   : > { %p1362_p9 = pnand %p1361_p8, %p1624_p3  ;;  %s1366_s17 = scalar_lea.vmem %s1365_s0, 512 }
 0x4af   : > { %p1367_p11 = scmp.lt.s32.totalorder %s1757_s19, %s1365_s0  ;;  %p1368_p0 = scmp.lt.s32.totalorder %s1366_s17, %s1360_s10 }
 0x4b0   : > { %p1363_p10 = pneg %p1362_p9 }
 0x4b1   : > { %p1369_p1 = por %p1368_p0, %p1367_p11 }
 0x4b3   : > { %p1370_p4 = pnand %p1369_p1, %p1363_p10 }
 0x4b5   : > { %1373 = shalt.err (!%p1370_p4)
}
 0x4b6   : > { %s1374_s29 = scalar_lea.hbm %s1755_s12, 256  ;;  %s1378_s14 = scalar_lea.hbm %s1868_s6, 512 }
 0x4b7   : > { %p1375_p2 = scmp.ne.s32.totalorder %s1755_s12, %s1374_s29  ;;  %p1379_p8 = scmp.lt.s32.totalorder %s1755_s12, %s1868_s6 }
 0x4b8   : > { %p1380_p9 = scmp.lt.s32.totalorder %s1378_s14, %s1374_s29 }
 0x4b9   : > { %p1376_p5 = pnand %p1375_p2, %p1624_p3 }
 0x4ba   : > { %p1381_p10 = por %p1380_p9, %p1379_p8 }
 0x4bb   : > { %p1377_p6 = pneg %p1376_p5 }
 0x4bd   : > { %p1382_p11 = pnand %p1381_p10, %p1377_p6 }
 0x4bf   : > { %1385 = shalt.err (!%p1382_p11)
}
 0x4c0   : > { %s1510_s0 = smov 128   ;;  %s1511_s10 = smov 8  }
 0x4c1   : > { %1249 = dma.vmem_to_hbm [thread:$0]  (%p1624_p3), %s1757_s19, 256, %s1755_s12, %s1761_s16, %s1510_s0, %s1510_s0, %s1511_s10  }
 0x4c2   : > { %s1116_s1 = sshll.u32 %s1490_s30, 1  ;;  %s1117_s17 = sshll.u32 %s1494_s8, 4 }
 0x4c3   : > { %s942_s29 = sadd.s32 %s1117_s17, %s1116_s1  ;;  %s945_s15 = sshll.u32 %s1705_s20, 4  ;;  %s1790_s15 = int_to_ptr.vmem [resolvable:$true] %s945_s15 }
 0x4c4   : > { %s1118_s23 = sshll.u32 %s942_s29, 7  ;;  %s1902_s18 = sand.u32 1, %s1470_s25  }
 0x4c5   : > { %s1795_s2 = scalar_lea.hbm %s1869_s7, %s1118_s23  ;;  %s910_s3 = scalar_lea.sflag [#allocation7], %s1902_s18 }
 0x4c6   : > { %s1386_s4 = scalar_lea.vmem %s1790_s15, 256  ;;  %s1512_s30 = smov [#allocation6]  }
 0x4c7   : > { %p1387_p0 = scmp.ne.s32.totalorder %s1790_s15, %s1386_s4  ;;  %s1390_s8 = sshll.u32 %s1512_s30, 4  ;;  %s1391_s8 = int_to_ptr.vmem [resolvable:$false] %s1390_s8 }
 0x4c8   : > { %s1392_s20 = scalar_lea.vmem %s1391_s8, 512  ;;  %p1393_p4 = scmp.lt.s32.totalorder %s1790_s15, %s1391_s8 }
 0x4c9   : > { %p1388_p3 = pnand %p1387_p0, %p1653_p12  ;;  %p1394_p2 = scmp.lt.s32.totalorder %s1392_s20, %s1386_s4 }
 0x4cb   : > { %p1389_p1 = pneg %p1388_p3  ;;  %p1395_p5 = por %p1394_p2, %p1393_p4 }
 0x4cd   : > { %p1396_p6 = pnand %p1395_p5, %p1389_p1 }
 0x4cf   : > { %1399 = shalt.err (!%p1396_p6)
}
 0x4d0   : > { %s1400_s12 = scalar_lea.hbm %s1795_s2, 256  ;;  %s1404_s1 = scalar_lea.hbm %s1869_s7, 4096 }
 0x4d1   : > { %p1401_p8 = scmp.ne.s32.totalorder %s1795_s2, %s1400_s12  ;;  %p1405_p11 = scmp.lt.s32.totalorder %s1795_s2, %s1869_s7 }
 0x4d2   : > { %p1406_p0 = scmp.lt.s32.totalorder %s1404_s1, %s1400_s12 }
 0x4d3   : > { %p1402_p9 = pnand %p1401_p8, %p1653_p12 }
 0x4d4   : > { %p1407_p3 = por %p1406_p0, %p1405_p11 }
 0x4d5   : > { %p1403_p10 = pneg %p1402_p9 }
 0x4d7   : > { %p1408_p1 = pnand %p1407_p3, %p1403_p10 }
 0x4d9   : > { %1411 = shalt.err (!%p1408_p1)
}
 0x4da   : > { %1250 = dma.vmem_to_hbm [thread:$0]  (%p1653_p12), %s1790_s15, 256, %s1795_s2, %s910_s3, %s1510_s0, %s1510_s0, %s1511_s10  }
 0x4db PF: > { %s1903_s4 = sld [smem:[#allocation10_spill]]  ;;  %p1260_p4 = scmp.ge.s32.totalorder %s1506_s11, 2 }
 0x4dd   : > { %p1254_p2 = pnand %p1260_p4, %p1641_p7 }
 0x4df   : > { %p1255_p5 = pneg %p1254_p2 }
 0x4e1   : > { %s960_s23 = sand.u32 1, %s1903_s4  }
 0x4e2   : > { %s961_s14 = scalar_lea.sflag [#allocation5], %s960_s23 }
 0x4e3   : > { %1457 = dma.done.wait (%p1255_p5), %s961_s14, 256  }
 0x4e4   : > { %1459 = vsyncadd (%p1255_p5), %s961_s14, 4294967040  ;;  %s969_s13 = sand.u32 1, %s1466_s24   ;;  %p1257_p6 = pnand %p1260_p4, %p1665_p13 }
 0x4e5   : > { %s970_s21 = scalar_lea.sflag [#allocation7], %s969_s13 }
 0x4e6   : > { %p1258_p8 = pneg %p1257_p6 }
 0x4e8   : > { %1461 = dma.done.wait (%p1258_p8), %s970_s21, 256  }
 0x4e9   : > { %1463 = vsyncadd (%p1258_p8), %s970_s21, 4294967040  ;;  %s24_s11 = sadd.s32 1, %s1506_s11   ;;  %s1904_s2 = sld [smem:[#allocation11_spill]] }
 0x4ea   : > { %p21_p12 = scmp.ge.s32.totalorder %s24_s11, 18   ;;  %s1905_s29 = sld [smem:[#allocation16_spill]] }
 0x4eb   : > { %s1906_s30 = sld [smem:[#allocation12_spill]]  ;;  %s1910_s24 = smov %s1470_s25 }
 0x4ec   : > { %s1907_s8 = sld [smem:[#allocation13_spill]]  ;;  %s1911_s25 = smov %s1474_s26 }
 0x4ed   : > { %s1908_s3 = sld [smem:[#allocation14_spill]]  ;;  %s1912_s26 = smov %s1661_s9 }
 0x4ee   : > { %s1909_s10 = sld [smem:[#allocation15_spill]]  ;;  %s1913_s27 = smov %s1482_s28 }
 0x4ef   : > { %s1914_s28 = smov %s1904_s2  ;;  %23 = sbr.rel (!%p21_p12) target bundleno = 15 (0xf), region = 117 }
 0x4f3   : > { %s1915_s9 = smov %s1908_s3 }
 0x4f4   :  { %975 = vsyncpa [#allocation5], 1 }
 0x4f5   :  { %977 = vsyncpa [#allocation5 + $0x1], 1 }
 0x4f6   :  { %978 = vsyncpa [#allocation7], 1 }
 0x4f7   :  { %980 = vsyncpa [#allocation7 + $0x1], 1 }

</bundles_post_ra>
